<compile_context>
chip_gen: v5e
topology: v5e:2x2
jax: 0.10.0
libtpu: 0.0.40
codegen_flags: <defaults>
</compile_context>

<pallas_src>
from functools import partial

import jax
import jax.numpy as jnp
from jax.experimental import pallas as pl
from jax.experimental.pallas import tpu as pltpu


def _round_up(x, m):
    return ((x + m - 1) // m) * m


def rnn_cell_kernel(xh_ref, w_ref, b_ref, out_ref):
    """One fused RNN-cell output tile.

    xh_ref:  (tm, Kp)  zero-padded [x | h] rows for this batch tile
    w_ref:   (Kp, tn)  pre-transposed, zero-padded [Wxh | Whh]^T columns
    b_ref:   (1,  tn)  bias slice
    out_ref: (tm, tn)  relu(xh @ W^T + b)
    """
    acc = jnp.dot(xh_ref[...], w_ref[...],
                  preferred_element_type=jnp.float32)   # single MXU push, f32 acc
    acc = acc + b_ref[...]                              # (1, tn) broadcast over rows (VPU)
    out_ref[...] = jnp.maximum(acc, 0.0).astype(out_ref.dtype)  # f32 epilogue, cast at store


def init_rnn_params(Wxh, Whh, b_hh):
    """One-time parameter preparation (done at model init, NOT per call).

    Wxh:  (H, I)  PyTorch nn.Linear weight layout (bias=False)
    Whh:  (H, H)  PyTorch nn.Linear weight layout
    b_hh: (H,)
    Returns padded, pre-transposed params ready for the kernel.
    """
    H, I = Wxh.shape
    K = I + H
    Kp = _round_up(K, 128)
    Hp = _round_up(H, 128)

    # [Wxh | Whh] in (out, in) layout, transposed once to (K, H) so the kernel
    # feeds the MXU with the natural (K, N) RHS layout (no in-kernel transpose).
    w_cat_t = jnp.concatenate([Wxh, Whh], axis=1).T            # (K, H)
    w_p = jnp.pad(w_cat_t, ((0, Kp - K), (0, Hp - H)))          # (Kp, Hp)
    b_p = jnp.pad(b_hh, (0, Hp - H)).reshape(1, Hp)             # (1, Hp)
    return {"w": w_p, "b": b_p, "I": int(I), "H": int(H)}


def make_rnn_forward(Wxh, Whh, b_hh):
    """Builds a jitted forward(x, h) with weights prepped once and held resident."""
    params = init_rnn_params(Wxh, Whh, b_hh)
    w_p, b_p = params["w"], params["b"]
    I, H = params["I"], params["H"]
    Kp, Hp = w_p.shape

    @jax.jit
    def forward(x, h):
        B = x.shape[0]
        K = I + H

        # --- per-call activation prep: one concat (+ one pad only if misaligned) ---
        xh = jnp.concatenate([x, h], axis=1)                    # (B, K)

        # Batch tile: multiple of 8 sublanes; cap at 256 so VMEM stays bounded
        # and large batches get an M grid axis.
        tm = min(256, _round_up(B, 8))
        Bp = _round_up(B, tm)
        if (Bp != B) or (Kp != K):
            xh = jnp.pad(xh, ((0, Bp - B), (0, Kp - K)))

        # Output (N) tile: lane-dense multiples of 128.
        if Hp <= 512:
            tn = Hp
        elif Hp % 256 == 0:
            tn = 256
        else:
            tn = 128
        grid = (Bp // tm, Hp // tn)

        cost = pl.CostEstimate(
            flops=2 * Bp * Hp * Kp,
            transcendentals=0,
            bytes_accessed=(Bp * Kp + Kp * Hp + Hp + Bp * Hp) * 4,
        )

        out_p = pl.pallas_call(
            rnn_cell_kernel,
            out_shape=jax.ShapeDtypeStruct((Bp, Hp), x.dtype),
            grid=grid,
            in_specs=[
                pl.BlockSpec((tm, Kp), lambda i, j: (i, 0)),   # activation rows for this M tile
                pl.BlockSpec((Kp, tn), lambda i, j: (0, j)),   # weight columns for this N tile
                pl.BlockSpec((1, tn), lambda i, j: (0, j)),    # bias slice
            ],
            out_specs=pl.BlockSpec((tm, tn), lambda i, j: (i, j)),
            compiler_params=pltpu.CompilerParams(
                # Both axes independent -> v7x megacore can shard either one
                # (batch axis gives it work even when H collapses to one tile).
                dimension_semantics=("parallel", "parallel"),
            ),
            cost_estimate=cost,
        )(xh, w_p, b_p)

        if (Bp == B) and (Hp == H):
            return out_p
        return out_p[:B, :H]

    return forward


if __name__ == "__main__":
    input_size = 32
    hidden_size = 32
    batch = 2

    key = jax.random.PRNGKey(0)
    k_x, k_h, k_wxh, k_whh, k_b = jax.random.split(key, 5)

    # Deterministic params mimicking nn.Linear's U(-1/sqrt(fan_in), 1/sqrt(fan_in))
    bound_x = 1.0 / (input_size ** 0.5)
    bound_h = 1.0 / (hidden_size ** 0.5)
    Wxh = jax.random.uniform(k_wxh, (hidden_size, input_size),
                             minval=-bound_x, maxval=bound_x, dtype=jnp.float32)
    Whh = jax.random.uniform(k_whh, (hidden_size, hidden_size),
                             minval=-bound_h, maxval=bound_h, dtype=jnp.float32)
    b_hh = jax.random.uniform(k_b, (hidden_size,),
                              minval=-bound_h, maxval=bound_h, dtype=jnp.float32)

    x = jax.random.normal(k_x, (batch, input_size), dtype=jnp.float32)
    h0 = jax.random.normal(k_h, (batch, hidden_size), dtype=jnp.float32)

    rnn_forward = make_rnn_forward(Wxh, Whh, b_hh)   # one-time weight prep
    h_new = rnn_forward(x, h0)
    jax.block_until_ready(h_new)

    # Reference in plain JAX (same math as the PyTorch module: ReLU, bias only on Whh).
    ref = jnp.maximum(x @ Wxh.T + h0 @ Whh.T + b_hh, 0.0)
    assert h_new.shape == ref.shape
    assert jnp.allclose(h_new, ref, atol=1e-5, rtol=1e-5), "mismatch vs reference"

    print("KERNEL_OK")
</pallas_src>

<mosaic_0001>
module attributes {stable_mosaic.version = 11 : i64} {
  func.func @rnn_cell_kernel(%arg0: i32, %arg1: i32, %arg2: memref<8x128xf32, #tpu.memory_space<vmem>>, %arg3: memref<128x128xf32, #tpu.memory_space<vmem>>, %arg4: memref<1x128xf32, #tpu.memory_space<vmem>>, %arg5: memref<8x128xf32, #tpu.memory_space<vmem>>) attributes {dimension_semantics = [#tpu.dimension_semantics<parallel>, #tpu.dimension_semantics<parallel>], iteration_bounds = array<i64: 1, 1>, scalar_prefetch = 0 : i64, scratch_operands = 0 : i64, tpu.core_type = #tpu.core_type<tc>, window_params = [{transform_indices = @transform_0, window_bounds = array<i64: 8, 128>}, {transform_indices = @transform_1, window_bounds = array<i64: 128, 128>}, {transform_indices = @transform_2, window_bounds = array<i64: 1, 128>}, {transform_indices = @transform_3, window_bounds = array<i64: 8, 128>}]} {
    %c0 = arith.constant 0 : index
    %c0_0 = arith.constant 0 : index
    %0 = vector.load %arg2[%c0, %c0_0] : memref<8x128xf32, #tpu.memory_space<vmem>>, vector<8x128xf32>
    %c0_1 = arith.constant 0 : index
    %c0_2 = arith.constant 0 : index
    %1 = vector.load %arg3[%c0_1, %c0_2] : memref<128x128xf32, #tpu.memory_space<vmem>>, vector<128x128xf32>
    %cst = arith.constant dense<0.000000e+00> : vector<8x128xf32>
    %2 = tpu.matmul %0, %1, %cst {dimension_numbers = #tpu.dot_dimension_numbers<[1], [0], [0], [1], [0, 0, 1, 1], [], []>} : vector<8x128xf32>, vector<128x128xf32>, vector<8x128xf32> -> vector<8x128xf32>
    %c0_3 = arith.constant 0 : index
    %c0_4 = arith.constant 0 : index
    %3 = vector.load %arg4[%c0_3, %c0_4] : memref<1x128xf32, #tpu.memory_space<vmem>>, vector<1x128xf32>
    %4 = vector.broadcast %3 : vector<1x128xf32> to vector<8x128xf32>
    %5 = arith.addf %2, %4 : vector<8x128xf32>
    %cst_5 = arith.constant 0.000000e+00 : f32
    %6 = vector.broadcast %cst_5 : f32 to vector<8x128xf32>
    %7 = arith.maximumf %5, %6 : vector<8x128xf32>
    %c0_6 = arith.constant 0 : index
    %c0_7 = arith.constant 0 : index
    %8 = vector.load %arg5[%c0_6, %c0_7] : memref<8x128xf32, #tpu.memory_space<vmem>>, vector<8x128xf32>
    tpu.vector_store %arg5[%c0_6, %c0_7], %7 {strides = array<i32>} : memref<8x128xf32, #tpu.memory_space<vmem>>, vector<8x128xf32>,
    return
  }
  func.func @transform_0(%arg0: i32, %arg1: i32) -> (i32, i32) {
    %c0_i32 = arith.constant 0 : i32
    %c0_i32_0 = arith.constant 0 : i32
    return %arg0, %c0_i32 : i32, i32
  }
  func.func @transform_1(%arg0: i32, %arg1: i32) -> (i32, i32) {
    %c0_i32 = arith.constant 0 : i32
    %c0_i32_0 = arith.constant 0 : i32
    return %c0_i32, %arg1 : i32, i32
  }
  func.func @transform_2(%arg0: i32, %arg1: i32) -> (i32, i32) {
    %c0_i32 = arith.constant 0 : i32
    %c0_i32_0 = arith.constant 0 : i32
    return %c0_i32, %arg1 : i32, i32
  }
  func.func @transform_3(%arg0: i32, %arg1: i32) -> (i32, i32) {
    %c0_i32 = arith.constant 0 : i32
    return %arg0, %arg1 : i32, i32
  }
}

</mosaic_0001>

<bundles_post_ra>
// kernel: forward.1
= control target key start
LH: loop header
LB: loop body
LE: loop exit
PB: predicated region body
PF: predicated region fallthrough
CT: control target
= control target key end

     0   :  { %8 = vsyncpa [#allocation3], 0  ;;  %s108_s15 = smov [#allocation2]   ;;  %s109_s17 = smov 128   ;;  %s143_s0 = inlined_call_operand.vmem [shape: f32[8,128], index: 0, kind: input, shape index: {}]   ;;  %s144_s1 = inlined_call_operand.hbm [shape: f32[128,128], index: 1, kind: input, shape index: {}]   ;;  %s145_s2 = inlined_call_operand.vmem [shape: f32[1,128], index: 2, kind: input, shape index: {}]   ;;  %s146_s3 = inlined_call_operand.vmem [shape: f32[8,128], index: 3, kind: output, shape index: {}]  }
   0x1   :  { %s15_s14 = sshll.u32 %s144_s1, 4  ;;  %s17_s16 = sshll.u32 %s108_s15, 4  ;;  %s16_s14 = int_to_ptr.hbm [resolvable:$true] %s15_s14  ;;  %s18_s16 = int_to_ptr.vmem [resolvable:$true] %s17_s16 }
   0x2   :  { %s110_s18 = smov 8  }
   0x3   :  { %23 = dma.hbm_to_vmem [thread:$0]  %s16_s14, 2048, %s18_s16, [#allocation3], %s109_s17, %s109_s17, %s110_s18  }
   0x4   :  { %106 = dma.done.wait [#allocation3], 2048  }
   0x5   :  { %107 = vsyncadd [#allocation3], 4294965248  ;;  %v46_v0 = vld [vmem:[#allocation2 + $0x78] sm:$0xff]  ;;  %v45_v1 = vld [vmem:[#allocation2 + $0x70] sm:$0xff] }
   0x6   :  { %51 = vmatpush.msra.mxu0 %v46_v0  ;;  %v44_v2 = vld [vmem:[#allocation2 + $0x68] sm:$0xff]  ;;  %v43_v3 = vld [vmem:[#allocation2 + $0x60] sm:$0xff]  ;;  %v42_v4 = vld [vmem:[#allocation2 + $0x58] sm:$0xff] }
   0x7   :  { %v41_v5 = vld [vmem:[#allocation2 + $0x50] sm:$0xff]  ;;  %v40_v6 = vld [vmem:[#allocation2 + $0x48] sm:$0xff]  ;;  %v39_v7 = vld [vmem:[#allocation2 + $0x40] sm:$0xff] }
   0x8   :  { %52 = vmatpush.msra.mxu0 %v45_v1  ;;  %v38_v8 = vld [vmem:[#allocation2 + $0x38] sm:$0xff]  ;;  %v37_v9 = vld [vmem:[#allocation2 + $0x30] sm:$0xff]  ;;  %v36_v10 = vld [vmem:[#allocation2 + $0x28] sm:$0xff] }
   0x9   :  { %v35_v11 = vld [vmem:[#allocation2 + $0x20] sm:$0xff]  ;;  %v34_v12 = vld [vmem:[#allocation2 + $0x18] sm:$0xff]  ;;  %v33_v13 = vld [vmem:[#allocation2 + $0x10] sm:$0xff] }
   0xa   :  { %53 = vmatpush.msra.mxu0 %v44_v2  ;;  %v32_v14 = vld [vmem:[#allocation2 + $0x8] sm:$0xff]  ;;  %v31_v15 = vld [vmem:[#allocation2] sm:$0xff] }
   0xb   :  { %v30_v16 = vld [vmem:[%s143_s0] sm:$0xff] }
   0xc   :  { %54 = vmatpush.msra.mxu0 %v43_v3  ;;  %v81_v17 = vld [vmem:[%s145_s2] ss:$0 sm:$0xff] }
   0xe   :  { %55 = vmatpush.msra.mxu0 %v42_v4 }
  0x10   :  { %56 = vmatpush.msra.mxu0 %v41_v5 }
  0x12   :  { %57 = vmatpush.msra.mxu0 %v40_v6 }
  0x14   :  { %58 = vmatpush.msra.mxu0 %v39_v7 }
  0x16   :  { %59 = vmatpush.msra.mxu0 %v38_v8 }
  0x18   :  { %60 = vmatpush.msra.mxu0 %v37_v9 }
  0x1a   :  { %61 = vmatpush.msra.mxu0 %v36_v10 }
  0x1c   :  { %62 = vmatpush.msra.mxu0 %v35_v11 }
  0x1e   :  { %63 = vmatpush.msra.mxu0 %v34_v12 }
  0x20   :  { %64 = vmatpush.msra.mxu0 %v33_v13 }
  0x22   :  { %65 = vmatpush.msra.mxu0 %v32_v14 }
  0x24   :  { %66 = vmatpush.msra.mxu0 %v31_v15 }
  0x25   :  { %67 = vmatmul.f32.vlgmr.msra.gmra.mxu0 %v30_v16 }
  0xa2   :  { %v68_v18 = vpop.f32.mrf.mxu0 }
  0xa3   :  { %v69_v19 = vadd.f32 %v81_v17, %v68_v18 }
  0xa5   :  { %v71_v20 = vmax.f32 %v69_v19, 0.0 }
  0xa7   :  { %72 = vst [vmem:[%s146_s3] sm:$0xff] %v71_v20 }
  0xa8   :  { %77 = vsyncpa [#allocation3], 1 }

</bundles_post_ra>
